<compile_context>
chip_gen: v7x
topology: tpu7x:2x2x1
jax: 0.10.0
libtpu: 0.0.40
codegen_flags: <defaults>
</compile_context>

<pallas_src>
import functools

import jax
import jax.numpy as jnp
from jax import lax
from jax.experimental import pallas as pl
from jax.experimental.pallas import tpu as pltpu


# -----------------------------------------------------------------------------
# Fused kernel: conv1+bn1+relu -> conv2+bn2 -> (+shortcut) -> relu
# Layout inside the kernel: images are folded to (rows, W*C) so W and C share
# the lane axis; conv taps along W (and W zero-padding) are pre-folded into
# banded matmul weights of shape (3, W*Cin, Wo*Cout).
# -----------------------------------------------------------------------------
def _fused_residual_kernel(x_ref, w1b_ref, sc1_ref, bi1_ref,
                           w2b_ref, sc2_ref, bi2_ref, *rest,
                           stride, identity_shortcut):
    if identity_shortcut:
        o_ref, xpad_ref, hpad_ref = rest
        wscb_ref = scsc_ref = bisc_ref = None
    else:
        wscb_ref, scsc_ref, bisc_ref, o_ref, xpad_ref, hpad_ref = rest

    H = x_ref.shape[1]            # input rows
    Ho = o_ref.shape[1]           # output rows
    WCi = xpad_ref.shape[1]       # folded W*Cin lanes
    WoCo = hpad_ref.shape[1]      # folded Wo*Cout lanes

    # ---- stage H-padded input in VMEM (W padding already folded into weights)
    zrow_x = jnp.zeros((1, WCi), dtype=xpad_ref.dtype)
    xpad_ref[0:1, :] = zrow_x
    xpad_ref[H + 1:H + 2, :] = zrow_x
    xpad_ref[1:H + 1, :] = x_ref[0].astype(xpad_ref.dtype)   # bf16 -> bf16 (no-op)

    def tap_rows(pad_ref, kh, n_rows, s):
        if s == 1:
            return pad_ref[kh:kh + n_rows, :]
        return pad_ref[pl.ds(kh, n_rows, stride=s), :]

    # ---- conv1 (3x3, stride) + folded BN1 + ReLU : 3 fat matmuls, K = W*Cin
    acc = jnp.zeros((Ho, WoCo), jnp.float32)
    for kh in range(3):
        rows = tap_rows(xpad_ref, kh, Ho, stride)             # bf16 operand
        acc = acc + jnp.dot(rows, w1b_ref[kh],
                            preferred_element_type=jnp.float32)
    h = jnp.maximum(acc * sc1_ref[...] + bi1_ref[...], 0.0)   # f32 epilogue

    # ---- keep h in VMEM only (never written to HBM), H-padded for conv2
    zrow_h = jnp.zeros((1, WoCo), dtype=hpad_ref.dtype)
    hpad_ref[0:1, :] = zrow_h
    hpad_ref[Ho + 1:Ho + 2, :] = zrow_h
    hpad_ref[1:Ho + 1, :] = h.astype(hpad_ref.dtype)          # f32 -> bf16 once

    # ---- conv2 (3x3, stride 1) + folded BN2
    acc2 = jnp.zeros((Ho, WoCo), jnp.float32)
    for kh in range(3):
        rows = hpad_ref[kh:kh + Ho, :]                        # bf16 operand
        acc2 = acc2 + jnp.dot(rows, w2b_ref[kh],
                              preferred_element_type=jnp.float32)
    main = acc2 * sc2_ref[...] + bi2_ref[...]

    # ---- shortcut branch
    if identity_shortcut:
        sc = x_ref[0].astype(jnp.float32)                 # plain VPU add, no MXU
    else:
        if stride == 1:
            xs = x_ref[0]                                 # already bf16
        else:
            xs = xpad_ref[pl.ds(1, Ho, stride=stride), :]
        sc = jnp.dot(xs, wscb_ref[...], preferred_element_type=jnp.float32)
        sc = sc * scsc_ref[...] + bisc_ref[...]

    o_ref[0] = jnp.maximum(main + sc, 0.0)


# -----------------------------------------------------------------------------
# Weight preprocessing (wrapper-side, tiny, runs once per call on the weights)
# -----------------------------------------------------------------------------
def _fold_bn(gamma, beta, mean, var, eps=1e-5):
    scale = gamma / jnp.sqrt(var + eps)
    bias = beta - mean * scale
    return scale, bias


def _band_3x3(w_hwio, w_in, w_out, stride):
    """Fold kw taps + W zero-padding of a 3x3 conv into per-kh banded weights.

    Returns (3, w_in*Cin, w_out*Cout): one (K, N) matmul weight per kh tap that
    acts on a whole folded image row (W and C merged onto the lane axis).
    """
    _, _, ci, co = w_hwio.shape
    jw = jnp.arange(w_in)[None, :, None]           # input column (unpadded)
    jo = jnp.arange(w_out)[None, None, :]          # output column
    kw = jnp.arange(3)[:, None, None]
    sel = (jw == jo * stride + kw - 1).astype(w_hwio.dtype)   # (3, w_in, w_out)
    band = jnp.einsum('wRJ,hwio->hRiJo', sel, w_hwio)
    return band.reshape(3, w_in * ci, w_out * co)


def _band_1x1(w_io, w_in, w_out, stride):
    """1x1 shortcut conv (stride folded into the column selection)."""
    ci, co = w_io.shape
    jw = jnp.arange(w_in)[:, None]
    jo = jnp.arange(w_out)[None, :]
    sel = (jw == jo * stride).astype(w_io.dtype)
    band = jnp.einsum('RJ,io->RiJo', sel, w_io)
    return band.reshape(w_in * ci, w_out * co)


def _tile_vec(v, w_out):
    return jnp.tile(v, w_out).reshape(1, w_out * v.shape[0]).astype(jnp.float32)


# -----------------------------------------------------------------------------
# ResidualBlock wrapper (takes NCHW like PyTorch, returns NCHW)
# -----------------------------------------------------------------------------
def residual_block_forward(x_nchw, params, *, stride=1):
    x = jnp.transpose(x_nchw, (0, 2, 3, 1))        # NCHW -> NHWC
    N, H, W, Cin = x.shape
    w1, w2 = params["w1"], params["w2"]            # HWIO, f32
    Cout = w1.shape[-1]
    Ho = (H - 1) // stride + 1
    Wo = (W - 1) // stride + 1
    identity = (stride == 1 and Cin == Cout)

    s1, b1 = _fold_bn(*params["bn1"])
    s2, b2 = _fold_bn(*params["bn2"])

    # banded bf16 matmul weights + lane-tiled f32 BN scale/bias
    w1b = _band_3x3(w1, W, Wo, stride).astype(jnp.bfloat16)
    w2b = _band_3x3(w2, Wo, Wo, 1).astype(jnp.bfloat16)
    sc1, bi1 = _tile_vec(s1, Wo), _tile_vec(b1, Wo)
    sc2, bi2 = _tile_vec(s2, Wo), _tile_vec(b2, Wo)

    x_f = x.reshape(N, H, W * Cin).astype(jnp.bfloat16)   # fold W,C onto lanes

    inputs = [x_f, w1b, sc1, bi1, w2b, sc2, bi2]
    in_specs = [
        pl.BlockSpec((1, H, W * Cin), lambda n: (n, 0, 0)),
        pl.BlockSpec((3, W * Cin, Wo * Cout), lambda n: (0, 0, 0)),
        pl.BlockSpec((1, Wo * Cout), lambda n: (0, 0)),
        pl.BlockSpec((1, Wo * Cout), lambda n: (0, 0)),
        pl.BlockSpec((3, Wo * Cout, Wo * Cout), lambda n: (0, 0, 0)),
        pl.BlockSpec((1, Wo * Cout), lambda n: (0, 0)),
        pl.BlockSpec((1, Wo * Cout), lambda n: (0, 0)),
    ]
    if not identity:
        ssc, bsc = _fold_bn(*params["bn_sc"])
        wscb = _band_1x1(params["w_sc"], W, Wo, stride).astype(jnp.bfloat16)
        inputs += [wscb, _tile_vec(ssc, Wo), _tile_vec(bsc, Wo)]
        in_specs += [
            pl.BlockSpec((W * Cin, Wo * Cout), lambda n: (0, 0)),
            pl.BlockSpec((1, Wo * Cout), lambda n: (0, 0)),
            pl.BlockSpec((1, Wo * Cout), lambda n: (0, 0)),
        ]

    kernel = functools.partial(_fused_residual_kernel,
                               stride=stride, identity_shortcut=identity)

    out = pl.pallas_call(
        kernel,
        out_shape=jax.ShapeDtypeStruct((N, Ho, Wo * Cout), jnp.float32),
        grid_spec=pltpu.PrefetchScalarGridSpec(
            num_scalar_prefetch=0,
            grid=(N,),
            in_specs=in_specs,
            out_specs=pl.BlockSpec((1, Ho, Wo * Cout), lambda n: (n, 0, 0)),
            scratch_shapes=[
                pltpu.VMEM((H + 2, W * Cin), jnp.bfloat16),      # H-padded input
                pltpu.VMEM((Ho + 2, Wo * Cout), jnp.bfloat16),   # conv1 activation
            ]),
        compiler_params=pltpu.CompilerParams(
            dimension_semantics=("parallel",),
            vmem_limit_bytes=32 * 1024 * 1024),
    )(*inputs)

    out = out.reshape(N, Ho, Wo, Cout)
    return jnp.transpose(out, (0, 3, 1, 2))        # NHWC -> NCHW


# -----------------------------------------------------------------------------
# Pure-JAX reference with the same bf16-operand / f32-accumulate strategy
# -----------------------------------------------------------------------------
def reference_forward(x_nchw, params, *, stride=1):
    x = jnp.transpose(x_nchw, (0, 2, 3, 1))
    N, H, W, Cin = x.shape
    Cout = params["w1"].shape[-1]
    dn = ("NHWC", "HWIO", "NHWC")
    s1, b1 = _fold_bn(*params["bn1"])
    s2, b2 = _fold_bn(*params["bn2"])
    xb = x.astype(jnp.bfloat16)
    c1 = lax.conv_general_dilated(xb, params["w1"].astype(jnp.bfloat16),
                                  (stride, stride), ((1, 1), (1, 1)),
                                  dimension_numbers=dn,
                                  preferred_element_type=jnp.float32)
    h = jnp.maximum(c1 * s1 + b1, 0.0)
    c2 = lax.conv_general_dilated(h.astype(jnp.bfloat16),
                                  params["w2"].astype(jnp.bfloat16),
                                  (1, 1), ((1, 1), (1, 1)),
                                  dimension_numbers=dn,
                                  preferred_element_type=jnp.float32)
    main = c2 * s2 + b2
    if stride != 1 or Cin != Cout:
        ssc, bsc = _fold_bn(*params["bn_sc"])
        wsc = params["w_sc"].reshape(1, 1, Cin, Cout).astype(jnp.bfloat16)
        sc = lax.conv_general_dilated(xb, wsc, (stride, stride), "VALID",
                                      dimension_numbers=dn,
                                      preferred_element_type=jnp.float32)
        sc = sc * ssc + bsc
    else:
        sc = xb.astype(jnp.float32)[:, ::stride, ::stride, :]
    out = jnp.maximum(main + sc, 0.0)
    return jnp.transpose(out, (0, 3, 1, 2))


# -----------------------------------------------------------------------------
if __name__ == "__main__":
    key = jax.random.PRNGKey(0)

    def make_params(k, cin, cout, with_shortcut):
        ks = jax.random.split(k, 8)
        # conv weights in PyTorch OIHW, converted to HWIO for the kernel
        w1_oihw = jax.random.normal(ks[0], (cout, cin, 3, 3), jnp.float32) * 0.1
        w2_oihw = jax.random.normal(ks[1], (cout, cout, 3, 3), jnp.float32) * 0.1

        def bn(kb):
            k1, k2, k3, k4 = jax.random.split(kb, 4)
            gamma = 1.0 + 0.1 * jax.random.normal(k1, (cout,), jnp.float32)
            beta = 0.1 * jax.random.normal(k2, (cout,), jnp.float32)
            mean = 0.1 * jax.random.normal(k3, (cout,), jnp.float32)
            var = jax.random.uniform(k4, (cout,), jnp.float32, minval=0.5, maxval=1.5)
            return gamma, beta, mean, var

        p = {
            "w1": jnp.transpose(w1_oihw, (2, 3, 1, 0)),            # HWIO
            "w2": jnp.transpose(w2_oihw, (2, 3, 1, 0)),            # HWIO
            "bn1": bn(ks[2]),
            "bn2": bn(ks[3]),
        }
        if with_shortcut:
            wsc_oihw = jax.random.normal(ks[4], (cout, cin, 1, 1), jnp.float32) * 0.1
            p["w_sc"] = jnp.transpose(wsc_oihw[:, :, 0, 0], (1, 0))  # (Cin, Cout)
            p["bn_sc"] = bn(ks[5])
        return p

    configs = [
        dict(name="conv-shortcut", N=2, Cin=4, Cout=8, H=16, W=16, stride=1),
        dict(name="identity-shortcut", N=2, Cin=8, Cout=8, H=16, W=16, stride=1),
    ]
    for i, cfg in enumerate(configs):
        kx, kp = jax.random.split(jax.random.fold_in(key, i))
        x = jax.random.normal(kx, (cfg["N"], cfg["Cin"], cfg["H"], cfg["W"]),
                              jnp.float32)
        needs_sc = cfg["stride"] != 1 or cfg["Cin"] != cfg["Cout"]
        params = make_params(kp, cfg["Cin"], cfg["Cout"], needs_sc)

        out = jax.block_until_ready(
            residual_block_forward(x, params, stride=cfg["stride"]))
        ref = jax.block_until_ready(
            reference_forward(x, params, stride=cfg["stride"]))

        Ho = (cfg["H"] - 1) // cfg["stride"] + 1
        Wo = (cfg["W"] - 1) // cfg["stride"] + 1
        assert out.shape == (cfg["N"], cfg["Cout"], Ho, Wo), out.shape
        err = jnp.max(jnp.abs(out - ref))
        assert jnp.allclose(out, ref, rtol=1e-2, atol=1e-2), \
            f"{cfg['name']}: max abs err {err}"

    print("KERNEL_OK")
</pallas_src>

<mosaic_0001>
module attributes {stable_mosaic.version = 11 : i64} {
  func.func @_fused_residual_kernel(%arg0: i32, %arg1: memref<1x16x64xbf16, #tpu.memory_space<vmem>>, %arg2: memref<3x64x128xbf16, #tpu.memory_space<vmem>>, %arg3: memref<1x128xf32, #tpu.memory_space<vmem>>, %arg4: memref<1x128xf32, #tpu.memory_space<vmem>>, %arg5: memref<3x128x128xbf16, #tpu.memory_space<vmem>>, %arg6: memref<1x128xf32, #tpu.memory_space<vmem>>, %arg7: memref<1x128xf32, #tpu.memory_space<vmem>>, %arg8: memref<64x128xbf16, #tpu.memory_space<vmem>>, %arg9: memref<1x128xf32, #tpu.memory_space<vmem>>, %arg10: memref<1x128xf32, #tpu.memory_space<vmem>>, %arg11: memref<1x16x128xf32, #tpu.memory_space<vmem>>, %arg12: memref<18x64xbf16, #tpu.memory_space<vmem>>, %arg13: memref<18x128xbf16, #tpu.memory_space<vmem>>) attributes {dimension_semantics = [#tpu.dimension_semantics<parallel>], iteration_bounds = array<i64: 2>, scalar_prefetch = 0 : i64, scratch_operands = 2 : i64, tpu.core_type = #tpu.core_type<tc>, window_params = [{transform_indices = @transform_0, window_bounds = array<i64: 1, 16, 64>}, {pipeline_mode = #tpu.pipeline_mode<synchronous>, transform_indices = @transform_1, window_bounds = array<i64: 3, 64, 128>}, {pipeline_mode = #tpu.pipeline_mode<synchronous>, transform_indices = @transform_2, window_bounds = array<i64: 1, 128>}, {pipeline_mode = #tpu.pipeline_mode<synchronous>, transform_indices = @transform_3, window_bounds = array<i64: 1, 128>}, {pipeline_mode = #tpu.pipeline_mode<synchronous>, transform_indices = @transform_4, window_bounds = array<i64: 3, 128, 128>}, {pipeline_mode = #tpu.pipeline_mode<synchronous>, transform_indices = @transform_5, window_bounds = array<i64: 1, 128>}, {pipeline_mode = #tpu.pipeline_mode<synchronous>, transform_indices = @transform_6, window_bounds = array<i64: 1, 128>}, {pipeline_mode = #tpu.pipeline_mode<synchronous>, transform_indices = @transform_7, window_bounds = array<i64: 64, 128>}, {pipeline_mode = #tpu.pipeline_mode<synchronous>, transform_indices = @transform_8, window_bounds = array<i64: 1, 128>}, {pipeline_mode = #tpu.pipeline_mode<synchronous>, transform_indices = @transform_9, window_bounds = array<i64: 1, 128>}, {transform_indices = @transform_10, window_bounds = array<i64: 1, 16, 128>}]} {
    %cst = arith.constant 0.000000e+00 : bf16
    %0 = vector.broadcast %cst : bf16 to vector<1x64xbf16>
    %c0 = arith.constant 0 : index
    %c0_0 = arith.constant 0 : index
    %1 = vector.load %arg12[%c0, %c0_0] : memref<18x64xbf16, #tpu.memory_space<vmem>>, vector<1x64xbf16>
    tpu.vector_store %arg12[%c0, %c0_0], %0 {strides = array<i32>} : memref<18x64xbf16, #tpu.memory_space<vmem>>, vector<1x64xbf16>,
    %c17 = arith.constant 17 : index
    %c0_1 = arith.constant 0 : index
    %2 = vector.load %arg12[%c17, %c0_1] : memref<18x64xbf16, #tpu.memory_space<vmem>>, vector<1x64xbf16>
    tpu.vector_store %arg12[%c17, %c0_1], %0 {strides = array<i32>} : memref<18x64xbf16, #tpu.memory_space<vmem>>, vector<1x64xbf16>,
    %c0_2 = arith.constant 0 : index
    %c0_3 = arith.constant 0 : index
    %c0_4 = arith.constant 0 : index
    %3 = vector.load %arg1[%c0_2, %c0_3, %c0_4] : memref<1x16x64xbf16, #tpu.memory_space<vmem>>, vector<1x16x64xbf16>
    %4 = vector.shape_cast %3 : vector<1x16x64xbf16> to vector<16x64xbf16>
    %c1 = arith.constant 1 : index
    %c0_5 = arith.constant 0 : index
    %5 = vector.load %arg12[%c1, %c0_5] : memref<18x64xbf16, #tpu.memory_space<vmem>>, vector<16x64xbf16>
    tpu.vector_store %arg12[%c1, %c0_5], %4 {strides = array<i32>} : memref<18x64xbf16, #tpu.memory_space<vmem>>, vector<16x64xbf16>,
    %cst_6 = arith.constant 0.000000e+00 : f32
    %6 = vector.broadcast %cst_6 : f32 to vector<16x128xf32>
    %c0_7 = arith.constant 0 : index
    %c0_8 = arith.constant 0 : index
    %7 = vector.load %arg12[%c0_7, %c0_8] : memref<18x64xbf16, #tpu.memory_space<vmem>>, vector<16x64xbf16>
    %c0_9 = arith.constant 0 : index
    %c0_10 = arith.constant 0 : index
    %c0_11 = arith.constant 0 : index
    %8 = vector.load %arg2[%c0_9, %c0_10, %c0_11] : memref<3x64x128xbf16, #tpu.memory_space<vmem>>, vector<1x64x128xbf16>
    %9 = vector.shape_cast %8 : vector<1x64x128xbf16> to vector<64x128xbf16>
    %cst_12 = arith.constant dense<0.000000e+00> : vector<16x128xf32>
    %10 = tpu.matmul %7, %9, %cst_12 {dimension_numbers = #tpu.dot_dimension_numbers<[1], [0], [0], [1], [0, 0, 1, 1], [], []>} : vector<16x64xbf16>, vector<64x128xbf16>, vector<16x128xf32> -> vector<16x128xf32>
    %11 = arith.addf %6, %10 : vector<16x128xf32>
    %c1_13 = arith.constant 1 : index
    %c0_14 = arith.constant 0 : index
    %12 = vector.load %arg12[%c1_13, %c0_14] : memref<18x64xbf16, #tpu.memory_space<vmem>>, vector<16x64xbf16>
    %c1_15 = arith.constant 1 : index
    %c0_16 = arith.constant 0 : index
    %c0_17 = arith.constant 0 : index
    %13 = vector.load %arg2[%c1_15, %c0_16, %c0_17] : memref<3x64x128xbf16, #tpu.memory_space<vmem>>, vector<1x64x128xbf16>
    %14 = vector.shape_cast %13 : vector<1x64x128xbf16> to vector<64x128xbf16>
    %cst_18 = arith.constant dense<0.000000e+00> : vector<16x128xf32>
    %15 = tpu.matmul %12, %14, %cst_18 {dimension_numbers = #tpu.dot_dimension_numbers<[1], [0], [0], [1], [0, 0, 1, 1], [], []>} : vector<16x64xbf16>, vector<64x128xbf16>, vector<16x128xf32> -> vector<16x128xf32>
    %16 = arith.addf %11, %15 : vector<16x128xf32>
    %c2 = arith.constant 2 : index
    %c0_19 = arith.constant 0 : index
    %17 = vector.load %arg12[%c2, %c0_19] : memref<18x64xbf16, #tpu.memory_space<vmem>>, vector<16x64xbf16>
    %c2_20 = arith.constant 2 : index
    %c0_21 = arith.constant 0 : index
    %c0_22 = arith.constant 0 : index
    %18 = vector.load %arg2[%c2_20, %c0_21, %c0_22] : memref<3x64x128xbf16, #tpu.memory_space<vmem>>, vector<1x64x128xbf16>
    %19 = vector.shape_cast %18 : vector<1x64x128xbf16> to vector<64x128xbf16>
    %cst_23 = arith.constant dense<0.000000e+00> : vector<16x128xf32>
    %20 = tpu.matmul %17, %19, %cst_23 {dimension_numbers = #tpu.dot_dimension_numbers<[1], [0], [0], [1], [0, 0, 1, 1], [], []>} : vector<16x64xbf16>, vector<64x128xbf16>, vector<16x128xf32> -> vector<16x128xf32>
    %21 = arith.addf %16, %20 : vector<16x128xf32>
    %c0_24 = arith.constant 0 : index
    %c0_25 = arith.constant 0 : index
    %22 = vector.load %arg3[%c0_24, %c0_25] : memref<1x128xf32, #tpu.memory_space<vmem>>, vector<1x128xf32>
    %23 = vector.broadcast %22 : vector<1x128xf32> to vector<16x128xf32>
    %24 = arith.mulf %21, %23 : vector<16x128xf32>
    %c0_26 = arith.constant 0 : index
    %c0_27 = arith.constant 0 : index
    %25 = vector.load %arg4[%c0_26, %c0_27] : memref<1x128xf32, #tpu.memory_space<vmem>>, vector<1x128xf32>
    %26 = vector.broadcast %25 : vector<1x128xf32> to vector<16x128xf32>
    %27 = arith.addf %24, %26 : vector<16x128xf32>
    %cst_28 = arith.constant 0.000000e+00 : f32
    %28 = vector.broadcast %cst_28 : f32 to vector<16x128xf32>
    %29 = arith.maximumf %27, %28 : vector<16x128xf32>
    %cst_29 = arith.constant 0.000000e+00 : bf16
    %30 = vector.broadcast %cst_29 : bf16 to vector<1x128xbf16>
    %c0_30 = arith.constant 0 : index
    %c0_31 = arith.constant 0 : index
    %31 = vector.load %arg13[%c0_30, %c0_31] : memref<18x128xbf16, #tpu.memory_space<vmem>>, vector<1x128xbf16>
    tpu.vector_store %arg13[%c0_30, %c0_31], %30 {strides = array<i32>} : memref<18x128xbf16, #tpu.memory_space<vmem>>, vector<1x128xbf16>,
    %c17_32 = arith.constant 17 : index
    %c0_33 = arith.constant 0 : index
    %32 = vector.load %arg13[%c17_32, %c0_33] : memref<18x128xbf16, #tpu.memory_space<vmem>>, vector<1x128xbf16>
    tpu.vector_store %arg13[%c17_32, %c0_33], %30 {strides = array<i32>} : memref<18x128xbf16, #tpu.memory_space<vmem>>, vector<1x128xbf16>,
    %33 = arith.truncf %29 : vector<16x128xf32> to vector<16x128xbf16>
    %c1_34 = arith.constant 1 : index
    %c0_35 = arith.constant 0 : index
    %34 = vector.load %arg13[%c1_34, %c0_35] : memref<18x128xbf16, #tpu.memory_space<vmem>>, vector<16x128xbf16>
    tpu.vector_store %arg13[%c1_34, %c0_35], %33 {strides = array<i32>} : memref<18x128xbf16, #tpu.memory_space<vmem>>, vector<16x128xbf16>,
    %cst_36 = arith.constant 0.000000e+00 : f32
    %35 = vector.broadcast %cst_36 : f32 to vector<16x128xf32>
    %c0_37 = arith.constant 0 : index
    %c0_38 = arith.constant 0 : index
    %36 = vector.load %arg13[%c0_37, %c0_38] : memref<18x128xbf16, #tpu.memory_space<vmem>>, vector<16x128xbf16>
    %c0_39 = arith.constant 0 : index
    %c0_40 = arith.constant 0 : index
    %c0_41 = arith.constant 0 : index
    %37 = vector.load %arg5[%c0_39, %c0_40, %c0_41] : memref<3x128x128xbf16, #tpu.memory_space<vmem>>, vector<1x128x128xbf16>
    %38 = vector.shape_cast %37 : vector<1x128x128xbf16> to vector<128x128xbf16>
    %cst_42 = arith.constant dense<0.000000e+00> : vector<16x128xf32>
    %39 = tpu.matmul %36, %38, %cst_42 {dimension_numbers = #tpu.dot_dimension_numbers<[1], [0], [0], [1], [0, 0, 1, 1], [], []>} : vector<16x128xbf16>, vector<128x128xbf16>, vector<16x128xf32> -> vector<16x128xf32>
    %40 = arith.addf %35, %39 : vector<16x128xf32>
    %c1_43 = arith.constant 1 : index
    %c0_44 = arith.constant 0 : index
    %41 = vector.load %arg13[%c1_43, %c0_44] : memref<18x128xbf16, #tpu.memory_space<vmem>>, vector<16x128xbf16>
    %c1_45 = arith.constant 1 : index
    %c0_46 = arith.constant 0 : index
    %c0_47 = arith.constant 0 : index
    %42 = vector.load %arg5[%c1_45, %c0_46, %c0_47] : memref<3x128x128xbf16, #tpu.memory_space<vmem>>, vector<1x128x128xbf16>
    %43 = vector.shape_cast %42 : vector<1x128x128xbf16> to vector<128x128xbf16>
    %cst_48 = arith.constant dense<0.000000e+00> : vector<16x128xf32>
    %44 = tpu.matmul %41, %43, %cst_48 {dimension_numbers = #tpu.dot_dimension_numbers<[1], [0], [0], [1], [0, 0, 1, 1], [], []>} : vector<16x128xbf16>, vector<128x128xbf16>, vector<16x128xf32> -> vector<16x128xf32>
    %45 = arith.addf %40, %44 : vector<16x128xf32>
    %c2_49 = arith.constant 2 : index
    %c0_50 = arith.constant 0 : index
    %46 = vector.load %arg13[%c2_49, %c0_50] : memref<18x128xbf16, #tpu.memory_space<vmem>>, vector<16x128xbf16>
    %c2_51 = arith.constant 2 : index
    %c0_52 = arith.constant 0 : index
    %c0_53 = arith.constant 0 : index
    %47 = vector.load %arg5[%c2_51, %c0_52, %c0_53] : memref<3x128x128xbf16, #tpu.memory_space<vmem>>, vector<1x128x128xbf16>
    %48 = vector.shape_cast %47 : vector<1x128x128xbf16> to vector<128x128xbf16>
    %cst_54 = arith.constant dense<0.000000e+00> : vector<16x128xf32>
    %49 = tpu.matmul %46, %48, %cst_54 {dimension_numbers = #tpu.dot_dimension_numbers<[1], [0], [0], [1], [0, 0, 1, 1], [], []>} : vector<16x128xbf16>, vector<128x128xbf16>, vector<16x128xf32> -> vector<16x128xf32>
    %50 = arith.addf %45, %49 : vector<16x128xf32>
    %c0_55 = arith.constant 0 : index
    %c0_56 = arith.constant 0 : index
    %51 = vector.load %arg6[%c0_55, %c0_56] : memref<1x128xf32, #tpu.memory_space<vmem>>, vector<1x128xf32>
    %52 = vector.broadcast %51 : vector<1x128xf32> to vector<16x128xf32>
    %53 = arith.mulf %50, %52 : vector<16x128xf32>
    %c0_57 = arith.constant 0 : index
    %c0_58 = arith.constant 0 : index
    %54 = vector.load %arg7[%c0_57, %c0_58] : memref<1x128xf32, #tpu.memory_space<vmem>>, vector<1x128xf32>
    %55 = vector.broadcast %54 : vector<1x128xf32> to vector<16x128xf32>
    %56 = arith.addf %53, %55 : vector<16x128xf32>
    %c0_59 = arith.constant 0 : index
    %c0_60 = arith.constant 0 : index
    %c0_61 = arith.constant 0 : index
    %57 = vector.load %arg1[%c0_59, %c0_60, %c0_61] : memref<1x16x64xbf16, #tpu.memory_space<vmem>>, vector<1x16x64xbf16>
    %58 = vector.shape_cast %57 : vector<1x16x64xbf16> to vector<16x64xbf16>
    %c0_62 = arith.constant 0 : index
    %c0_63 = arith.constant 0 : index
    %59 = vector.load %arg8[%c0_62, %c0_63] : memref<64x128xbf16, #tpu.memory_space<vmem>>, vector<64x128xbf16>
    %cst_64 = arith.constant dense<0.000000e+00> : vector<16x128xf32>
    %60 = tpu.matmul %58, %59, %cst_64 {dimension_numbers = #tpu.dot_dimension_numbers<[1], [0], [0], [1], [0, 0, 1, 1], [], []>} : vector<16x64xbf16>, vector<64x128xbf16>, vector<16x128xf32> -> vector<16x128xf32>
    %c0_65 = arith.constant 0 : index
    %c0_66 = arith.constant 0 : index
    %61 = vector.load %arg9[%c0_65, %c0_66] : memref<1x128xf32, #tpu.memory_space<vmem>>, vector<1x128xf32>
    %62 = vector.broadcast %61 : vector<1x128xf32> to vector<16x128xf32>
    %63 = arith.mulf %60, %62 : vector<16x128xf32>
    %c0_67 = arith.constant 0 : index
    %c0_68 = arith.constant 0 : index
    %64 = vector.load %arg10[%c0_67, %c0_68] : memref<1x128xf32, #tpu.memory_space<vmem>>, vector<1x128xf32>
    %65 = vector.broadcast %64 : vector<1x128xf32> to vector<16x128xf32>
    %66 = arith.addf %63, %65 : vector<16x128xf32>
    %67 = arith.addf %56, %66 : vector<16x128xf32>
    %cst_69 = arith.constant 0.000000e+00 : f32
    %68 = vector.broadcast %cst_69 : f32 to vector<16x128xf32>
    %69 = arith.maximumf %67, %68 : vector<16x128xf32>
    %c0_70 = arith.constant 0 : index
    %c0_71 = arith.constant 0 : index
    %c0_72 = arith.constant 0 : index
    %70 = vector.load %arg11[%c0_70, %c0_71, %c0_72] : memref<1x16x128xf32, #tpu.memory_space<vmem>>, vector<1x16x128xf32>
    %71 = vector.shape_cast %70 : vector<1x16x128xf32> to vector<16x128xf32>
    %72 = vector.shape_cast %69 : vector<16x128xf32> to vector<1x16x128xf32>
    tpu.vector_store %arg11[%c0_70, %c0_71, %c0_72], %72 {strides = array<i32>} : memref<1x16x128xf32, #tpu.memory_space<vmem>>, vector<1x16x128xf32>,
    return
  }
  func.func @transform_0(%arg0: i32) -> (i32, i32, i32) {
    %c0_i32 = arith.constant 0 : i32
    %c0_i32_0 = arith.constant 0 : i32
    %c0_i32_1 = arith.constant 0 : i32
    return %arg0, %c0_i32, %c0_i32_0 : i32, i32, i32
  }
  func.func @transform_1(%arg0: i32) -> (i32, i32, i32) {
    %c0_i32 = arith.constant 0 : i32
    %c0_i32_0 = arith.constant 0 : i32
    %c0_i32_1 = arith.constant 0 : i32
    %c0_i32_2 = arith.constant 0 : i32
    return %c0_i32, %c0_i32_0, %c0_i32_1 : i32, i32, i32
  }
  func.func @transform_2(%arg0: i32) -> (i32, i32) {
    %c0_i32 = arith.constant 0 : i32
    %c0_i32_0 = arith.constant 0 : i32
    %c0_i32_1 = arith.constant 0 : i32
    return %c0_i32, %c0_i32_0 : i32, i32
  }
  func.func @transform_3(%arg0: i32) -> (i32, i32) {
    %c0_i32 = arith.constant 0 : i32
    %c0_i32_0 = arith.constant 0 : i32
    %c0_i32_1 = arith.constant 0 : i32
    return %c0_i32, %c0_i32_0 : i32, i32
  }
  func.func @transform_4(%arg0: i32) -> (i32, i32, i32) {
    %c0_i32 = arith.constant 0 : i32
    %c0_i32_0 = arith.constant 0 : i32
    %c0_i32_1 = arith.constant 0 : i32
    %c0_i32_2 = arith.constant 0 : i32
    return %c0_i32, %c0_i32_0, %c0_i32_1 : i32, i32, i32
  }
  func.func @transform_5(%arg0: i32) -> (i32, i32) {
    %c0_i32 = arith.constant 0 : i32
    %c0_i32_0 = arith.constant 0 : i32
    %c0_i32_1 = arith.constant 0 : i32
    return %c0_i32, %c0_i32_0 : i32, i32
  }
  func.func @transform_6(%arg0: i32) -> (i32, i32) {
    %c0_i32 = arith.constant 0 : i32
    %c0_i32_0 = arith.constant 0 : i32
    %c0_i32_1 = arith.constant 0 : i32
    return %c0_i32, %c0_i32_0 : i32, i32
  }
  func.func @transform_7(%arg0: i32) -> (i32, i32) {
    %c0_i32 = arith.constant 0 : i32
    %c0_i32_0 = arith.constant 0 : i32
    %c0_i32_1 = arith.constant 0 : i32
    return %c0_i32, %c0_i32_0 : i32, i32
  }
  func.func @transform_8(%arg0: i32) -> (i32, i32) {
    %c0_i32 = arith.constant 0 : i32
    %c0_i32_0 = arith.constant 0 : i32
    %c0_i32_1 = arith.constant 0 : i32
    return %c0_i32, %c0_i32_0 : i32, i32
  }
  func.func @transform_9(%arg0: i32) -> (i32, i32) {
    %c0_i32 = arith.constant 0 : i32
    %c0_i32_0 = arith.constant 0 : i32
    %c0_i32_1 = arith.constant 0 : i32
    return %c0_i32, %c0_i32_0 : i32, i32
  }
  func.func @transform_10(%arg0: i32) -> (i32, i32, i32) {
    %c0_i32 = arith.constant 0 : i32
    %c0_i32_0 = arith.constant 0 : i32
    %c0_i32_1 = arith.constant 0 : i32
    return %arg0, %c0_i32, %c0_i32_0 : i32, i32, i32
  }
}

</mosaic_0001>

<bundles_post_ra>
// kernel: tpu_custom_call.1
= control target key start
LH: loop header
LB: loop body
LE: loop exit
PB: predicated region body
PF: predicated region fallthrough
CT: control target
= control target key end

     0   :  { %s2424_s0 = inlined_call_operand.hbm [shape: bf16[2,16,64], index: 0, kind: input, shape index: {}]   ;;  %s2425_s1 = inlined_call_operand.hbm [shape: bf16[3,64,128], index: 1, kind: input, shape index: {}]   ;;  %s2426_s2 = inlined_call_operand.vmem [shape: f32[1,128], index: 2, kind: input, shape index: {}]   ;;  %s2427_s3 = inlined_call_operand.vmem [shape: f32[1,128], index: 3, kind: input, shape index: {}]   ;;  %s2428_s4 = inlined_call_operand.hbm [shape: bf16[3,128,128], index: 4, kind: input, shape index: {}]   ;;  %s2429_s5 = inlined_call_operand.vmem [shape: f32[1,128], index: 5, kind: input, shape index: {}]   ;;  %s2430_s6 = inlined_call_operand.vmem [shape: f32[1,128], index: 6, kind: input, shape index: {}]   ;;  %s2431_s7 = inlined_call_operand.hbm [shape: bf16[64,128], index: 7, kind: input, shape index: {}]   ;;  %s2432_s8 = inlined_call_operand.vmem [shape: f32[1,128], index: 8, kind: input, shape index: {}]   ;;  %s2433_s9 = inlined_call_operand.vmem [shape: f32[1,128], index: 9, kind: input, shape index: {}]   ;;  %s2434_s10 = inlined_call_operand.hbm [shape: f32[2,16,128], index: 10, kind: output, shape index: {}]  }
   0x1   :  { %2441 = sst [smem:[#allocation19_spill]] %s2430_s6 }
   0x2   :  { %2442 = sst [smem:[#allocation20_spill]] %s2434_s10 }
   0x3   :  { %15 = vsyncpa [#allocation5], 0 }
   0x4   :  { %17 = vsyncpa [#allocation5 + $0x1], 0 }
   0x5   :  { %18 = vsyncpa [#allocation8], 0 }
   0x6   :  { %19 = vsyncpa [#allocation11], 0 }
   0x7   :  { %20 = vsyncpa [#allocation6], 0 }
   0x8   :  { %22 = vsyncpa [#allocation6 + $0x1], 0  ;;  %s2029_s13 = smov 0   ;;  %s2031_s14 = smov 0  }
   0x9   :  { %s2033_s15 = smov 0   ;;  %s2035_s16 = smov 0  }
   0xa LB: > { %2443 = sst [smem:[#allocation17_spill]] %s1949_s13  ;;  %s2050_s17 = sadd.s32 4294967295, %s1961_s16   ;;  %s1961_s16 = sphi %s2035_s16, %s2477_s16   ;;  %s1957_s15 = sphi %s2033_s15, %s2476_s15   ;;  %s1953_s14 = sphi %s2031_s14, %s2475_s14   ;;  %s1949_s13 = sphi %s2029_s13, %s2474_s13  }
   0xb   : > { %s1389_s18 = sadd.s32 4294967294, %s1961_s16   ;;  %p48_p0 = scmp.ne.s32.totalorder %s1953_s14, %s1949_s13 }
   0xc   : > { %p2435_p1 = scmp.eq.s32.totalorder %s2050_s17, 0  ;;  %p267_p3 = scmp.eq.s32.totalorder %s1389_s18, 1 }
   0xd   : > { %p1390_p5 = scmp.ge.s32.totalorder %s1961_s16, 1  ;;  %p274_p7 = scmp.lt.s32.totalorder %s1961_s16, 3 }
   0xe   : > { %p2059_p4 = por %p2435_p1, %p48_p0  ;;  %p2064_p6 = por %p267_p3, %p48_p0 }
   0xf   : > { %p2069_p8 = pnand %p1390_p5, %p274_p7  ;;  %s1963_s22 = smov [#allocation7]  }
  0x10   : > { %s2444_s19 = scalar_select %p2059_p4, 1, 0 }
  0x11   : > { %s2445_s20 = scalar_select %p2064_p6, 1, 0 }
  0x12   : > { %s2447_s21 = scalar_select %p2069_p8, 1, 0 }
  0x13   : > { %2446 = sst [smem:[#allocation18_spill]] %s2445_s20  ;;  %s286_s23 = sshll.u32 %s1963_s22, 4  ;;  %s2073_s23 = int_to_ptr.vmem [resolvable:$true] %s286_s23 }
  0x14   : > { %p1659_p9 = pneg %p2069_p8  ;;  %s1964_s25 = smov [#allocation9]  }
  0x15   : > { %s305_s26 = sshll.u32 %s1964_s25, 4  ;;  %s1965_s27 = smov [#allocation10]   ;;  %s2084_s26 = int_to_ptr.vmem [resolvable:$true] %s305_s26 }
  0x16   : > { %p2080_p11 = pnand %p1659_p9, %p2435_p1  ;;  %s2086_s28 = sshll.u32 %s1965_s27, 4  ;;  %s325_s28 = int_to_ptr.vmem [resolvable:$true] %s2086_s28 }
  0x17   : > { %s1773_s11 = scalar_lea.hbm %s2425_s1, 1536 }
  0x18   : > { %p1774_p12 = scmp.ne.s32.totalorder %s2425_s1, %s1773_s11  ;;  %p2096_p13 = pneg %p2080_p11 }
  0x19   : > { %p1780_p5 = scmp.lt.u32.totalorder %s1773_s11, %s2425_s1 }
  0x1a   : > { %p1776_p0 = pnand %p2096_p13, %p1774_p12 }
  0x1c   : > { %p1777_p3 = pneg %p1776_p0 }
  0x1e   : > { %p1782_p7 = pnand %p1780_p5, %p1777_p3 }
  0x20   : > { %1785 = shalt.err (!%p1782_p7)
}
  0x21   : > { %s1786_s29 = scalar_lea.vmem %s2073_s23, 1536  ;;  %p1794_p2 = scmp.lt.s32.totalorder %s2073_s23, %s2073_s23 }
  0x22   : > { %p1787_p9 = scmp.ne.s32.totalorder %s2073_s23, %s1786_s29  ;;  %p1795_p6 = scmp.lt.s32.totalorder %s1786_s29, %s1786_s29 }
  0x24   : > { %p1789_p10 = pnand %p1787_p9, %p2096_p13  ;;  %p1796_p12 = por %p1795_p6, %p1794_p2 }
  0x26   : > { %p1790_p1 = pneg %p1789_p10 }
  0x28   : > { %p1797_p0 = pnand %p1796_p12, %p1790_p1 }
  0x2a   : > { %1800 = shalt.err (!%p1797_p0)
}
  0x2b   : > { %s1966_s30 = smov 64   ;;  %s1967_s11 = smov 4  }
  0x2c   : > { %1662 = dma.hbm_to_vmem [thread:$0]  (!%p2080_p11), %s2425_s1, 1536, %s2073_s23, [#allocation8], %s1966_s30, %s1966_s30, %s1967_s11  }
  0x2d   : > { %s1801_s29 = scalar_lea.hbm %s2428_s4, 3072 }
  0x2e   : > { %p1802_p1 = scmp.ne.s32.totalorder %s2428_s4, %s1801_s29  ;;  %p1808_p10 = scmp.lt.u32.totalorder %s1801_s29, %s2428_s4 }
  0x30   : > { %p1804_p2 = pnand %p1802_p1, %p2096_p13 }
  0x32   : > { %p1805_p6 = pneg %p1804_p2 }
  0x34   : > { %p1810_p3 = pnand %p1808_p10, %p1805_p6 }
  0x36   : > { %1813 = shalt.err (!%p1810_p3)
}
  0x37   : > { %s1814_s23 = scalar_lea.vmem %s2084_s26, 3072  ;;  %p1822_p12 = scmp.lt.s32.totalorder %s2084_s26, %s2084_s26 }
  0x38   : > { %p1815_p5 = scmp.ne.s32.totalorder %s2084_s26, %s1814_s23  ;;  %p1823_p0 = scmp.lt.s32.totalorder %s1814_s23, %s1814_s23 }
  0x3a   : > { %p1817_p7 = pnand %p1815_p5, %p2096_p13  ;;  %p1824_p1 = por %p1823_p0, %p1822_p12 }
  0x3c   : > { %p1818_p9 = pneg %p1817_p7 }
  0x3e   : > { %p1825_p2 = pnand %p1824_p1, %p1818_p9 }
  0x40   : > { %1828 = shalt.err (!%p1825_p2)
}
  0x41   : > { %1665 = dma.hbm_to_vmem [thread:$0]  (!%p2080_p11), %s2428_s4, 3072, %s2084_s26, [#allocation8], %s1966_s30, %s1966_s30, %s1967_s11  }
  0x42   : > { %s1829_s12 = scalar_lea.hbm %s2431_s7, 512 }
  0x43   : > { %p1830_p6 = scmp.ne.s32.totalorder %s2431_s7, %s1829_s12  ;;  %p1836_p5 = scmp.lt.u32.totalorder %s1829_s12, %s2431_s7 }
  0x45   : > { %p1832_p10 = pnand %p1830_p6, %p2096_p13 }
  0x47   : > { %p1833_p3 = pneg %p1832_p10 }
  0x49   : > { %p1838_p7 = pnand %p1836_p5, %p1833_p3 }
  0x4b   : > { %1841 = shalt.err (!%p1838_p7)
}
  0x4c   : > { %s1842_s23 = scalar_lea.vmem %s325_s28, 512  ;;  %p1850_p1 = scmp.lt.s32.totalorder %s325_s28, %s325_s28 }
  0x4d   : > { %p1843_p9 = scmp.ne.s32.totalorder %s325_s28, %s1842_s23  ;;  %p1851_p2 = scmp.lt.s32.totalorder %s1842_s23, %s1842_s23 }
  0x4f   : > { %p1845_p12 = pnand %p1843_p9, %p2096_p13  ;;  %p1852_p4 = por %p1851_p2, %p1850_p1 }
  0x51   : > { %p1846_p0 = pneg %p1845_p12 }
  0x53   : > { %p1853_p8 = pnand %p1852_p4, %p1846_p0 }
  0x55   : > { %1856 = shalt.err (!%p1853_p8)
}
  0x56   : > { %1668 = dma.hbm_to_vmem [thread:$0]  (!%p2080_p11), %s2431_s7, 512, %s325_s28, [#allocation11], %s1966_s30, %s1966_s30, %s1967_s11  }
  0x57   : > { %s2169_s22 = sadd.s32 1, %s1961_s16   ;;  %s35_s10 = sadd.s32 1, %s1957_s15 }
  0x58   : > { %s32_s24 = ssub.s32 %s1961_s16, %s2169_s22  ;;  %p42_p8 = scmp.ne.s32.totalorder %s1957_s15, %s1953_s14 }
  0x59   : > { %p33_p4 = scmp.eq.s32.totalorder %s32_s24, 0  ;;  %p43_p13 = scmp.eq.s32.totalorder %s1961_s16, 0 }
  0x5a   : > { %p1680_p6 = scmp.lt.s32.totalorder %s1961_s16, 2  ;;  %p2450_p3 = scmp.eq.s32.totalorder %s2050_s17, 1 }
  0x5b   : > { %s2179_s13 = scalar_select %p33_p4, %s1957_s15, %s35_s10  }
  0x5c   : > { %p44_p10 = por %p43_p13, %p42_p8  ;;  %p2183_p5 = por %p2450_p3, %p42_p8 }
  0x5d   : > { %s344_s12 = sand.u32 1, %s1957_s15   ;;  %s1468_s18 = sshll.u32 %s1961_s16, 7 }
  0x5e   : > { %s1395_s28 = sshll.u32 %s344_s12, 3  ;;  %s2192_s29 = scalar_lea.hbm %s2424_s0, %s1468_s18 }
  0x5f   : > { %s348_s23 = scalar_lea.vmem [#allocation4], %s1395_s28  ;;  %p2194_p11 = pnand %p1680_p6, %p44_p10 }
  0x60   : > { %s355_s26 = sshll.u32 %s348_s23, 4  ;;  %s2200_s24 = scalar_lea.sflag [#allocation5], %s344_s12  ;;  %s2198_s26 = int_to_ptr.vmem [resolvable:$true] %s355_s26 }
  0x61   : > { %s1857_s10 = scalar_lea.hbm %s2192_s29, 128  ;;  %p1859_p9 = pneg %p2194_p11 }
  0x62   : > { %p1858_p7 = scmp.ne.s32.totalorder %s2192_s29, %s1857_s10  ;;  %s1862_s25 = scalar_lea.hbm %s2424_s0, 256 }
  0x63   : > { %p1863_p1 = scmp.lt.u32.totalorder %s2192_s29, %s2424_s0  ;;  %p1864_p2 = scmp.lt.u32.totalorder %s1862_s25, %s1857_s10 }
  0x64   : > { %p1860_p12 = pnand %p1859_p9, %p1858_p7  ;;  %p1866_p8 = scmp.lt.u32.totalorder %s1857_s10, %s2192_s29 }
  0x65   : > { %p1865_p4 = por %p1864_p2, %p1863_p1 }
  0x66   : > { %p1861_p0 = pneg %p1860_p12 }
  0x67   : > { %p1867_p13 = por %p1866_p8, %p1865_p4 }
  0x69   : > { %p1868_p6 = pnand %p1867_p13, %p1861_p0 }
  0x6b   : > { %1871 = shalt.err (!%p1868_p6)
}
  0x6c   : > { %s1872_s12 = scalar_lea.vmem %s2198_s26, 128  ;;  %s1968_s18 = smov [#allocation4]  }
  0x6d   : > { %p1873_p10 = scmp.ne.s32.totalorder %s2198_s26, %s1872_s12  ;;  %s1877_s28 = sshll.u32 %s1968_s18, 4  ;;  %s1878_s28 = int_to_ptr.vmem [resolvable:$false] %s1877_s28 }
  0x6e   : > { %s1879_s27 = scalar_lea.vmem %s1878_s28, 256  ;;  %p1880_p12 = scmp.lt.s32.totalorder %s2198_s26, %s1878_s28 }
  0x6f   : > { %p1875_p3 = pnand %p1873_p10, %p1859_p9  ;;  %p1881_p1 = scmp.lt.s32.totalorder %s1879_s27, %s1872_s12 }
  0x71   : > { %p1876_p7 = pneg %p1875_p3  ;;  %p1882_p2 = por %p1881_p1, %p1880_p12 }
  0x73   : > { %p1883_p4 = pnand %p1882_p2, %p1876_p7 }
  0x75   : > { %1886 = shalt.err (!%p1883_p4)
}
  0x76   : > { %1672 = dma.hbm_to_vmem [thread:$0]  (!%p2194_p11), %s2192_s29, 128, %s2198_s26, %s2200_s24, %s1966_s30, %s1966_s30, %s1967_s11  }
  0x77   : > { %p2453_p9 = scmp.ne.s32.totalorder %s2447_s21, 0 }
  0x78   : > { %s2234_s10 = sand.u32 (!%p2453_p9), 1, %s1953_s14   ;;  %p2454_p0 = scmp.ne.s32.totalorder (!%p2453_p9), %s2444_s19, 0 }
  0x79   : > { %367 = sbr.rel (%p2453_p9) target bundleno = 745 (0x2e9), region = 60  ;;  %s1399_s25 = sshll.u32 (!%p2453_p9), %s2234_s10, 3 }
  0x7a   : > { %s370_s23 = scalar_lea.sflag (!%p2453_p9), [#allocation5], %s2234_s10  ;;  %s2238_s12 = scalar_lea.vmem (!%p2453_p9), [#allocation4], %s1399_s25 }
  0x80   : > { %1932 = dma.done.wait (%p2454_p0), %s370_s23, 128  }
  0x81   : > { %1934 = vsyncadd (%p2454_p0), %s370_s23, 4294967168  ;;  %p2455_p11 = scmp.eq.s32.totalorder %s2050_s17, 0 }
  0x83   : > { %1936 = dma.done.wait (%p2455_p11), [#allocation8], 4608   ;;  %p2456_p8 = pmov %p2455_p11 }
  0x85   : > { %1938 = vsyncadd (%p2456_p8), [#allocation8], 4294962688  ;;  %p2457_p13 = pmov %p2456_p8 }
  0x86   : > { %p2458_p6 = pmov %p2456_p8 }
  0x87   : > { %1940 = dma.done.wait (%p2457_p13), [#allocation11], 512  }
  0x88   : > { %1942 = vsyncadd (%p2458_p6), [#allocation11], 4294966784  ;;  %v1969_v0 = vmov 0.0   ;;  %vm1970_vm0 = vmmov 0   ;;  %vm423_vm1 = vcmask 516096   ;;  %v1726_v2 = vld [vmem:[#allocation7 + $0x20] sm:$0xff]  }
  0x89   : > { %1519 = vmatprep.subr.bf16.mxu0 %v1969_v0  ;;  %1527 = vmatprep.mubr.msk.bf16.mxu0 %vm1970_vm0, %v1969_v0  ;;  %vm424_vm2 = vsmask.f32 256  ;;  %vm429_vm3 = vsmask.f32 7938  ;;  %v1727_v4 = vld [vmem:[#allocation7 + $0x28] sm:$0xff]   ;;  %v1728_v5 = vld [vmem:[#allocation7 + $0x30] sm:$0xff]  }
  0x8a   : > { %1555 = vmatprep.subr.bf16.mxu1 %v1969_v0  ;;  %1571 = vmatprep.mubr.msk.bf16.mxu1 %vm1970_vm0, %v1969_v0  ;;  %vm2259_vm4 = vmand %vm423_vm1, %vm424_vm2  ;;  %vm436_vm6 = vsmask.f32 4368  ;;  %v426_v6 = vld [vmem:[#allocation2] sm:$0x1]  ;;  %v431_v7 = vld [vmem:[#allocation2 + $0x8] sm:$0x1] }
  0x8b   : > { %vm2264_vm5 = vmand %vm423_vm1, %vm429_vm3  ;;  %1520 = vmatpush3.bf16.msra.mxu0 %v1726_v2  ;;  %v434_v8 = vld [vmem:[%s2238_s12] sm:$0xf]  ;;  %v427_v9 = vsel %vm2259_vm4, 0, %v426_v6  ;;  %v435_v11 = vld [vmem:[%s2238_s12 + $0x4] sm:$0xf]  ;;  %vm458_vm7 = vcmask 519168  }
  0x8c   : > { %1521 = vmatprep.subr.bf16.mxu0 %v1969_v0  ;;  %v432_v10 = vsel %vm2264_vm5, 0, %v431_v7  ;;  %v439_v12 = vshrl.u32 %v434_v8, 16  ;;  %v442_v13 = vshll.u32 %v434_v8, 16  ;;  %428 = vst [vmem:[#allocation2] sm:$0x1] %v427_v9  ;;  %v447_v14 = vshrl.u32 %v435_v11, 16  ;;  %vm2278_vm8 = vmor %vm424_vm2, %vm436_vm6 }
  0x8d   : > { %433 = vst [vmem:[#allocation2 + $0x8] sm:$0x1] %v432_v10  ;;  %v450_v15 = vshll.u32 %v435_v11, 16  ;;  %v1729_v20 = vld [vmem:[#allocation7 + $0x38] sm:$0xff]   ;;  %vm459_vm9 = vmand %vm458_vm7, %vm429_vm3  ;;  %vm496_vm10 = vsmask.f32 7424 }
  0x8e   : > { %v441_v16 = vrot.slane %v439_v12, 7  ;;  %v449_v17 = vrot.slane %v447_v14, 7  ;;  %vm533_vm11 = vcmask 523264   ;;  %v1732_v38 = vld [vmem:[#allocation7] sm:$0xff]   ;;  %v1733_v41 = vld [vmem:[#allocation7 + $0x8] sm:$0xff]   ;;  %v1734_v42 = vld [vmem:[#allocation7 + $0x10] sm:$0xff]  }
  0x8f   : > { %1522 = vmatpush3.bf16.msra.mxu0 %v1727_v4  ;;  %v1735_v43 = vld [vmem:[#allocation7 + $0x18] sm:$0xff]   ;;  %v1736_v44 = vld [vmem:[#allocation7 + $0x40] sm:$0xff]   ;;  %v1737_v45 = vld [vmem:[#allocation7 + $0x48] sm:$0xff]   ;;  %vm658_vm12 = vcmask 1046528   ;;  %vm752_vm13 = vcmask 1040384   ;;  %vm787_vm1 = vcmask 1043456  }
  0x90   : > { %1523 = vmatprep.subr.bf16.mxu0 %v1969_v0  ;;  %v445_v19 = vrot.slane %v441_v16, 4  ;;  %v444_v21 = vor.u32 %v442_v13, %v441_v16  ;;  %v452_v22 = vor.u32 %v450_v15, %v449_v17  ;;  %v454_v23 = vrot.slane %v449_v17, 4  ;;  %v1738_v47 = vld [vmem:[#allocation7 + $0x50] sm:$0xff]   ;;  %v1739_v49 = vld [vmem:[#allocation7 + $0x58] sm:$0xff]   ;;  %v1741_v53 = vld [vmem:[#allocation9 + $0x40] sm:$0xff]   ;;  %s1403_s18 = sshll.u32 %s2234_s10, 4 }
  0x91   : > { %1556 = vmatpush3.bf16.msra.mxu1 %v1741_v53  ;;  %vm2310_vm14 = vmand %vm752_vm13, %vm424_vm2  ;;  %v754_v55 = vld [vmem:[#allocation3] sm:$0x1]  ;;  %v1742_v56 = vld [vmem:[#allocation9 + $0x48] sm:$0xff]   ;;  %s421_s19 = scalar_lea.vmem [#allocation12], %s1403_s18  ;;  %s1471_s30 = sshll.u32 %s2050_s17, 8 }
  0x92   : > { %v453_v24 = vsel %vm2278_vm8, %v445_v19, %v452_v22  ;;  %1557 = vmatprep.subr.bf16.mxu1 %v1969_v0  ;;  %v755_v57 = vsel %vm2310_vm14, 0, %v754_v55  ;;  %vm757_vm15 = vmand %vm752_vm13, %vm429_vm3  ;;  %v758_v58 = vld [vmem:[#allocation3 + $0x8] sm:$0x1]  ;;  %v1743_v60 = vld [vmem:[#allocation9 + $0x50] sm:$0xff]   ;;  %s1287_s21 = sshll.u32 %s421_s19, 4  ;;  %s2468_s26 = sld [smem:[#allocation20_spill]]  ;;  %s2375_s21 = int_to_ptr.vmem [resolvable:$true] %s1287_s21 }
  0x93   : > { %1524 = vmatpush3.bf16.msra.mxu0 %v1728_v5  ;;  %v460_v25 = vld [vmem:[#allocation2] sm:$0xf]  ;;  %464 = vst.msk [vmem:[#allocation2 + $0x4] sm:$0xf] %vm458_vm7, %v453_v24  ;;  %756 = vst [vmem:[#allocation3] sm:$0x1] %v755_v57 }
  0x94   : > { %1525 = vmatprep.subr.bf16.mxu0 %v1969_v0  ;;  %v465_v26 = vld [vmem:[#allocation2 + $0x8] sm:$0x1]  ;;  %v461_v27 = vsel %vm459_vm9, %v444_v21, %v460_v25  ;;  %v759_v59 = vsel %vm757_vm15, 0, %v758_v58  ;;  %v1744_v61 = vld [vmem:[#allocation9 + $0x58] sm:$0xff]   ;;  %v1746_v63 = vld [vmem:[#allocation9 + $0x68] sm:$0xff]   ;;  %s1274_s24 = scalar_lea.sflag [#allocation6], %s2234_s10 }
  0x95   : > { %v466_v28 = vsel %vm2259_vm4, %v454_v23, %v465_v26  ;;  %462 = vst [vmem:[#allocation2] sm:$0xf] %v461_v27  ;;  %1558 = vmatpush3.bf16.msra.mxu1 %v1742_v56  ;;  %760 = vst [vmem:[#allocation3 + $0x8] sm:$0x1] %v759_v59  ;;  %v1745_v62 = vld [vmem:[#allocation9 + $0x60] sm:$0xff]   ;;  %v1747_v1 = vld [vmem:[#allocation9 + $0x70] sm:$0xff]  }
  0x96   : > { %467 = vst [vmem:[#allocation2 + $0x8] sm:$0x1] %v466_v28  ;;  %1559 = vmatprep.subr.bf16.mxu1 %v1969_v0  ;;  %v1748_v2 = vld [vmem:[#allocation9 + $0x78] sm:$0xff]   ;;  %v1763_v3 = vld [vmem:[#allocation10] sm:$0xff]   ;;  %v1765_v4 = vld [vmem:[#allocation10 + $0x8] sm:$0xff]   ;;  %s1887_s18 = scalar_lea.vmem %s2375_s21, 256 }
  0x97   : > { %1526 = vmatpush3.bf16.msra.mxu0 %v1729_v20  ;;  %v1767_v5 = vld [vmem:[#allocation10 + $0x10] sm:$0xff]   ;;  %v1769_v6 = vld [vmem:[#allocation10 + $0x18] sm:$0xff]   ;;  %vm788_vm2 = vmand %vm787_vm1, %vm429_vm3  ;;  %p1888_p10 = scmp.ne.s32.totalorder %s2375_s21, %s1887_s18  ;;  %s1971_s17 = smov [#allocation12]  }
  0x98   : > { %1531 = vmatprep.subr.bf16.mxu0 %v1969_v0  ;;  %v1771_v7 = vld [vmem:[%s2238_s12] sm:$0xff]   ;;  %v1752_v54 = vld [vmem:[#allocation9 + $0x8] sm:$0xff]   ;;  %v1755_v57 = vld [vmem:[#allocation9 + $0x20] sm:$0xff]   ;;  %s2467_s12 = sld [smem:[#allocation19_spill]]  ;;  %s2380_s6 = scalar_lea.hbm %s2468_s26, %s1471_s30 }
  0x99   : > { %1560 = vmatpush3.bf16.msra.mxu1 %v1743_v60  ;;  %v1422_v8 = vld [vmem:[%s2426_s2] ss:$0 sm:$0xff]  ;;  %v1753_v55 = vld [vmem:[#allocation9 + $0x10] sm:$0xff]   ;;  %v1756_v58 = vld [vmem:[#allocation9 + $0x28] sm:$0xff]   ;;  %p1889_p3 = pnand %p1888_p10, %p2183_p5  ;;  %s1891_s28 = sshll.u32 %s1971_s17, 4  ;;  %s1892_s28 = int_to_ptr.vmem [resolvable:$false] %s1891_s28 }
  0x9a   : > { %v469_v29 = vld [vmem:[#allocation2 + $0x4] sm:$0xf]  ;;  %1561 = vmatprep.subr.bf16.mxu1 %v1969_v0  ;;  %v1423_v10 = vld [vmem:[%s2427_s3] ss:$0 sm:$0xff]  ;;  %v789_v27 = vld [vmem:[#allocation3] sm:$0xf]  ;;  %p1894_p12 = scmp.lt.s32.totalorder %s2375_s21, %s1892_s28 }
  0x9b   : > { %v1754_v56 = vld [vmem:[#allocation9 + $0x18] sm:$0xff]   ;;  %v1757_v59 = vld [vmem:[#allocation9 + $0x30] sm:$0xff]   ;;  %p1890_p7 = pneg %p1889_p3  ;;  %s1893_s27 = scalar_lea.vmem %s1892_s28, 512 }
  0x9c   : > { %v468_v30 = vld [vmem:[#allocation2] sm:$0xf]  ;;  %p1895_p1 = scmp.lt.s32.totalorder %s1893_s27, %s1887_s18 }
  0x9d   : > { %v1404_v31 = vcombine.low %v468_v30, %v469_v29  ;;  %v1731_v32 = vld [vmem:[#allocation2 + $0x8] ss:$0 sps:$4 sm:$0x11]   ;;  %v645_v46 = vld [vmem:[#allocation2] sm:$0xe]  ;;  %1562 = vmatpush3.bf16.msra.mxu1 %v1744_v61 }
  0x9e   : > { %v505_v35 = vshll.u32 %v1731_v32, 16  ;;  %v1416_v48 = vcombine.low %v645_v46, %v469_v29  ;;  %v660_v51 = vrot.slane %v1731_v32, 1  ;;  %1563 = vmatprep.subr.bf16.mxu1 %v1969_v0  ;;  %v1758_v60 = vld [vmem:[#allocation9 + $0x38] sm:$0xff]   ;;  %v1759_v61 = vld [vmem:[#allocation9 + $0x80] sm:$0xff]   ;;  %p1896_p2 = por %p1895_p1, %p1894_p12 }
  0x9f   : > { %v498_v33 = vshrl.u32 %v1404_v31, 16  ;;  %v500_v34 = vshll.u32 %v1404_v31, 16 }
  0xa0   : > { %v507_v37 = vrot.slane %v505_v35, 1  ;;  %v659_v50 = vrot.slane %v1416_v48, 1  ;;  %p1897_p4 = pnand %p1896_p2, %p1890_p7 }
  0xa1   : > { %v502_v36 = vrot.slane %v500_v34, 1  ;;  %1564 = vmatpush3.bf16.msra.mxu1 %v1745_v62  ;;  %v1760_v62 = vld [vmem:[#allocation9 + $0x88] sm:$0xff]  }
  0xa2   : > { %v661_v52 = vsel %vm658_vm12, %v659_v50, %v660_v51  ;;  %1565 = vmatprep.subr.bf16.mxu1 %v1969_v0 }
  0xa3   : > { %v503_v39 = vor.u32 %v502_v36, %v498_v33 }
  0xa5   : > { %v508_v40 = vsel %vm496_vm10, %v503_v39, %v507_v37  ;;  %1566 = vmatpush3.bf16.msra.mxu1 %v1746_v63  ;;  %v1761_v63 = vld [vmem:[#allocation9 + $0x90] sm:$0xff]  }
  0xa6   : > { %1528 = vmatmul.mubr.msk.bf16.vlgmr.msra.gmra.mrb[0].mxu0 %vm533_vm11, %v508_v40  ;;  %1567 = vmatprep.subr.bf16.mxu1 %v1969_v0 }
  0xa7   : > { %1532 = vmatpush3.bf16.msra.mxu0 %v1732_v38  ;;  %1539 = vmatprep.mubr.msk.bf16.mxu0 %vm1970_vm0, %v1969_v0 }
  0xa8   : > { %1533 = vmatprep.subr.bf16.mxu0 %v1969_v0 }
  0xa9   : > { %1568 = vmatpush3.bf16.msra.mxu1 %v1747_v1  ;;  %v1762_v1 = vld [vmem:[#allocation9 + $0x98] sm:$0xff]  }
  0xaa   : > { %1569 = vmatprep.subr.bf16.mxu1 %v1969_v0 }
  0xab   : > { %1534 = vmatpush3.bf16.msra.mxu0 %v1733_v41 }
  0xac   : > { %1535 = vmatprep.subr.bf16.mxu0 %v1969_v0 }
  0xad   : > { %1570 = vmatpush3.bf16.msra.mxu1 %v1748_v2  ;;  %v1764_v2 = vld [vmem:[#allocation9 + $0xa0] sm:$0xff]  }
  0xae   : > { %1575 = vmatprep.subr.bf16.mxu1 %v1969_v0 }
  0xaf   : > { %1536 = vmatpush3.bf16.msra.mxu0 %v1734_v42 }
  0xb0   : > { %1537 = vmatprep.subr.bf16.mxu0 %v1969_v0 }
  0xb3   : > { %1538 = vmatpush3.bf16.msra.mxu0 %v1735_v43 }
  0xb4   : > { %1543 = vmatprep.subr.bf16.mxu0 %v1969_v0 }
  0xb6   : > { %1540 = vmatmul.mubr.msk.bf16.vlgmr.msra.gmra.mrb[0].mxu0 %vm533_vm11, %v1404_v31  ;;  %v793_v31 = vld [vmem:[#allocation3 + $0x8] sm:$0x1] }
  0xb7   : > { %1544 = vmatpush3.bf16.msra.mxu0 %v1736_v44  ;;  %1551 = vmatprep.mubr.msk.bf16.mxu0 %vm1970_vm0, %v1969_v0 }
  0xb8   : > { %1545 = vmatprep.subr.bf16.mxu0 %v1969_v0 }
  0xbb   : > { %1546 = vmatpush3.bf16.msra.mxu0 %v1737_v45 }
  0xbc   : > { %1547 = vmatprep.subr.bf16.mxu0 %v1969_v0 }
  0xbf   : > { %1548 = vmatpush3.bf16.msra.mxu0 %v1738_v47 }
  0xc0   : > { %1549 = vmatprep.subr.bf16.mxu0 %v1969_v0 }
  0xc3   : > { %1550 = vmatpush3.bf16.msra.mxu0 %v1739_v49 }
  0xc4   : > { %1615 = vmatprep.subr.bf16.mxu0 %v1969_v0 }
  0xc6   : > { %1552 = vmatmul.mubr.msk.bf16.vlgmr.msra.gmra.mrb[0].mxu0 %vm533_vm11, %v661_v52  ;;  %v1751_v52 = vld [vmem:[#allocation9] sm:$0xff]  }
  0xc7   : > { %1623 = vmatprep.mubr.msk.bf16.mxu0 %vm1970_vm0, %v1969_v0  ;;  %1616 = vmatpush3.bf16.msra.mxu0 %v1763_v3  ;;  %v1766_v3 = vld [vmem:[#allocation9 + $0xa8] sm:$0xff]  }
  0xc8   : > { %1617 = vmatprep.subr.bf16.mxu0 %v1969_v0 }
  0xcb   : > { %1618 = vmatpush3.bf16.msra.mxu0 %v1765_v4  ;;  %v1768_v4 = vld [vmem:[#allocation9 + $0xb0] sm:$0xff]  }
  0xcc   : > { %1619 = vmatprep.subr.bf16.mxu0 %v1969_v0 }
  0xcf   : > { %1620 = vmatpush3.bf16.msra.mxu0 %v1767_v5  ;;  %v1770_v5 = vld [vmem:[#allocation9 + $0xb8] sm:$0xff]  }
  0xd0   : > { %1621 = vmatprep.subr.bf16.mxu0 %v1969_v0 }
  0xd3   : > { %1622 = vmatpush3.bf16.msra.mxu0 %v1769_v6 }
  0xd6   : > { %1624 = vmatmul.mubr.msk.bf16.vlgmr.msra.gmra.mrb[4].mxu0 %vm533_vm11, %v1771_v7 }
 0x199   : > { %v723_v9 = vpop.f32.mrb[0].mxu0 }
 0x19a   : > { %v739_v11 = vmul.f32 %v1422_v8, %v723_v9  ;;  %v1553_v12 = vpop.f32.mrb[1].mxu0 }
 0x19b   : > { %v726_v13 = vpop.f32.mrb[2].mxu0  ;;  %v1462_v12 = vld [vmem:[%s2433_s9] ss:$0 sm:$0xff] }
 0x19c   : > { %v748_v14 = vadd.f32 %v1423_v10, %v739_v11  ;;  %v740_v15 = vmul.f32 %v1422_v8, %v726_v13  ;;  %v1554_v16 = vpop.f32.mrb[3].mxu0 }
 0x19e   : > { %v750_v17 = vmax.f32 %v748_v14, 0.0  ;;  %v749_v19 = vadd.f32 %v1423_v10, %v740_v15  ;;  %v1461_v10 = vld [vmem:[%s2432_s8] ss:$0 sm:$0xff] }
 0x19f   : > { %v1454_v14 = vld [vmem:[%s2467_s12] ss:$0 sm:$0xff] }
 0x1a0   : > { %v1469_v20 = vpack.c.bf16 %v750_v17, %v750_v17  ;;  %v751_v21 = vmax.f32 %v749_v19, 0.0 }
 0x1a2   : > { %v768_v22 = vshrl.u32 %v1469_v20, 16  ;;  %v1470_v23 = vpack.c.bf16 %v751_v21, %v751_v21  ;;  %v771_v25 = vshll.u32 %v1469_v20, 16 }
 0x1a4   : > { %v770_v24 = vrot.slane %v768_v22, 7  ;;  %v776_v26 = vshrl.u32 %v1470_v23, 16  ;;  %v779_v30 = vshll.u32 %v1470_v23, 16 }
 0x1a6   : > { %v773_v28 = vor.u32 %v771_v25, %v770_v24  ;;  %v778_v29 = vrot.slane %v776_v26, 7  ;;  %v774_v32 = vrot.slane %v770_v24, 4 }
 0x1a8   : > { %v790_v33 = vsel %vm788_vm2, %v773_v28, %v789_v27  ;;  %v781_v34 = vor.u32 %v779_v30, %v778_v29  ;;  %v783_v35 = vrot.slane %v778_v29, 4 }
 0x1a9   : > { %791 = vst [vmem:[#allocation3] sm:$0xf] %v790_v33  ;;  %v1242_v6 = vpop.f32.mrb[4].mxu0 }
 0x1aa   : > { %v782_v36 = vsel %vm2278_vm8, %v774_v32, %v781_v34  ;;  %v794_v37 = vsel %vm2310_vm14, %v783_v35, %v793_v31  ;;  %v1625_v7 = vpop.f32.mrb[5].mxu0  ;;  %v1256_v11 = vmul.f32 %v1461_v10, %v1242_v6 }
 0x1ab   : > { %792 = vst [vmem:[#allocation3 + $0x4] sm:$0xf] %v782_v36  ;;  %795 = vst [vmem:[#allocation3 + $0x8] sm:$0x1] %v794_v37  ;;  %v1245_v8 = vpop.f32.mrb[6].mxu0 }
 0x1ac   : > { %v1626_v9 = vpop.f32.mrb[7].mxu0  ;;  %v1265_v15 = vadd.f32 %v1462_v12, %v1256_v11  ;;  %v1257_v16 = vmul.f32 %v1461_v10, %v1245_v8 }
 0x1ae   : > { %v1266_v24 = vadd.f32 %v1462_v12, %v1257_v16 }
 0x1b0   : > { %v796_v38 = vld [vmem:[#allocation3] sm:$0xf] }
 0x1b1   : > { %v1032_v40 = vld [vmem:[#allocation3] sm:$0xe] }
 0x1b2   : > { %v797_v39 = vld [vmem:[#allocation3 + $0x4] sm:$0xf]  ;;  %v1750_v42 = vld [vmem:[#allocation3 + $0x8] ss:$0 sps:$4 sm:$0x11]  }
 0x1b3   : > { %v1426_v41 = vcombine.low %v796_v38, %v797_v39  ;;  %v1444_v43 = vcombine.low %v1032_v40, %v797_v39  ;;  %v848_v45 = vshll.u32 %v1750_v42, 16  ;;  %v1054_v47 = vrot.slane %v1750_v42, 1 }
 0x1b5   : > { %v843_v44 = vshll.u32 %v1426_v41, 16  ;;  %v1053_v46 = vrot.slane %v1444_v43, 1  ;;  %v841_v48 = vshrl.u32 %v1426_v41, 16  ;;  %v850_v51 = vrot.slane %v848_v45, 1 }
 0x1b7   : > { %v845_v49 = vrot.slane %v843_v44, 1  ;;  %v1055_v18 = vsel %vm658_vm12, %v1053_v46, %v1054_v47 }
 0x1b9   : > { %v846_v50 = vor.u32 %v845_v49, %v841_v48 }
 0x1bb   : > { %v851_v53 = vsel %vm496_vm10, %v846_v50, %v850_v51 }
 0x1bc   : > { %1572 = vmatmul.mubr.bf16.vlgmr.msra.gmra.mrb[0].mxu1 %v851_v53 }
 0x1bd   : > { %1576 = vmatpush3.bf16.msra.mxu1 %v1751_v52  ;;  %1591 = vmatprep.mubr.msk.bf16.mxu1 %vm1970_vm0, %v1969_v0 }
 0x1be   : > { %1577 = vmatprep.subr.bf16.mxu1 %v1969_v0 }
 0x1c1   : > { %1578 = vmatpush3.bf16.msra.mxu1 %v1752_v54 }
 0x1c2   : > { %1579 = vmatprep.subr.bf16.mxu1 %v1969_v0 }
 0x1c5   : > { %1580 = vmatpush3.bf16.msra.mxu1 %v1753_v55 }
 0x1c6   : > { %1581 = vmatprep.subr.bf16.mxu1 %v1969_v0 }
 0x1c9   : > { %1582 = vmatpush3.bf16.msra.mxu1 %v1754_v56 }
 0x1ca   : > { %1583 = vmatprep.subr.bf16.mxu1 %v1969_v0 }
 0x1cd   : > { %1584 = vmatpush3.bf16.msra.mxu1 %v1755_v57 }
 0x1ce   : > { %1585 = vmatprep.subr.bf16.mxu1 %v1969_v0 }
 0x1d1   : > { %1586 = vmatpush3.bf16.msra.mxu1 %v1756_v58 }
 0x1d2   : > { %1587 = vmatprep.subr.bf16.mxu1 %v1969_v0 }
 0x1d5   : > { %1588 = vmatpush3.bf16.msra.mxu1 %v1757_v59 }
 0x1d6   : > { %1589 = vmatprep.subr.bf16.mxu1 %v1969_v0 }
 0x1d9   : > { %1590 = vmatpush3.bf16.msra.mxu1 %v1758_v60 }
 0x1da   : > { %1595 = vmatprep.subr.bf16.mxu1 %v1969_v0 }
 0x1dc   : > { %1592 = vmatmul.mubr.bf16.vlgmr.msra.gmra.mrb[0].mxu1 %v1426_v41 }
 0x1dd   : > { %1596 = vmatpush3.bf16.msra.mxu1 %v1759_v61  ;;  %1611 = vmatprep.mubr.msk.bf16.mxu1 %vm1970_vm0, %v1969_v0 }
 0x1de   : > { %1597 = vmatprep.subr.bf16.mxu1 %v1969_v0 }
 0x1e1   : > { %1598 = vmatpush3.bf16.msra.mxu1 %v1760_v62 }
 0x1e2   : > { %1599 = vmatprep.subr.bf16.mxu1 %v1969_v0 }
 0x1e5   : > { %1600 = vmatpush3.bf16.msra.mxu1 %v1761_v63 }
 0x1e6   : > { %1601 = vmatprep.subr.bf16.mxu1 %v1969_v0 }
 0x1e9   : > { %1602 = vmatpush3.bf16.msra.mxu1 %v1762_v1 }
 0x1ea   : > { %1603 = vmatprep.subr.bf16.mxu1 %v1969_v0 }
 0x1ed   : > { %1604 = vmatpush3.bf16.msra.mxu1 %v1764_v2 }
 0x1ee   : > { %1605 = vmatprep.subr.bf16.mxu1 %v1969_v0 }
 0x1f1   : > { %1606 = vmatpush3.bf16.msra.mxu1 %v1766_v3 }
 0x1f2   : > { %1607 = vmatprep.subr.bf16.mxu1 %v1969_v0 }
 0x1f5   : > { %1608 = vmatpush3.bf16.msra.mxu1 %v1768_v4 }
 0x1f6   : > { %1609 = vmatprep.subr.bf16.mxu1 %v1969_v0  ;;  %v1453_v0 = vld [vmem:[%s2429_s5] ss:$0 sm:$0xff] }
 0x1f9   : > { %1610 = vmatpush3.bf16.msra.mxu1 %v1770_v5 }
 0x1fc   : > { %1612 = vmatmul.mubr.bf16.vlgmr.msra.gmra.mrb[0].mxu1 %v1055_v18 }
 0x2cf   : > { %v1139_v13 = vpop.f32.mrb[0].mxu1 }
 0x2d0   : > { %v1155_v17 = vmul.f32 %v1453_v0, %v1139_v13  ;;  %v1613_v19 = vpop.f32.mrb[1].mxu1 }
 0x2d1   : > { %v1142_v20 = vpop.f32.mrb[2].mxu1 }
 0x2d2   : > { %v1164_v21 = vadd.f32 %v1454_v14, %v1155_v17  ;;  %v1156_v22 = vmul.f32 %v1453_v0, %v1142_v20  ;;  %v1614_v23 = vpop.f32.mrb[3].mxu1 }
 0x2d4   : > { %v1267_v25 = vadd.f32 %v1265_v15, %v1164_v21  ;;  %v1165_v26 = vadd.f32 %v1454_v14, %v1156_v22 }
 0x2d6   : > { %v1269_v27 = vmax.f32 %v1267_v25, 0.0  ;;  %v1268_v28 = vadd.f32 %v1266_v24, %v1165_v26 }
 0x2d8   : > { %1271 = vst [vmem:[%s421_s19] sm:$0xff] %v1269_v27  ;;  %v1270_v29 = vmax.f32 %v1268_v28, 0.0 }
 0x2da   : > { %1272 = vst [vmem:[%s421_s19 + $0x8] sm:$0xff] %v1270_v29 }
 0x2db   : > { %1900 = shalt.err (!%p1897_p4)
}
 0x2dc   : > { %s1901_s25 = scalar_lea.hbm %s2380_s6, 256  ;;  %s1905_s19 = scalar_lea.hbm %s2468_s26, 512 }
 0x2dd   : > { %p1902_p9 = scmp.ne.s32.totalorder %s2380_s6, %s1901_s25  ;;  %p1906_p8 = scmp.lt.u32.totalorder %s2380_s6, %s2468_s26 }
 0x2de   : > { %p1907_p13 = scmp.lt.u32.totalorder %s1905_s19, %s1901_s25  ;;  %p1909_p10 = scmp.lt.u32.totalorder %s1901_s25, %s2380_s6 }
 0x2df   : > { %p1903_p0 = pnand %p1902_p9, %p2183_p5 }
 0x2e0   : > { %p1908_p6 = por %p1907_p13, %p1906_p8 }
 0x2e1   : > { %p1904_p11 = pneg %p1903_p0 }
 0x2e2   : > { %p1910_p3 = por %p1909_p10, %p1908_p6 }
 0x2e4   : > { %p1911_p7 = pnand %p1910_p3, %p1904_p11 }
 0x2e6   : > { %1914 = shalt.err (!%p1911_p7)
}
 0x2e7   : > { %s1972_s29 = smov 128   ;;  %s1973_s18 = smov 8  }
 0x2e8   : > { %1657 = dma.vmem_to_hbm [thread:$0]  (%p2183_p5), %s2375_s21, 256, %s2380_s6, %s1274_s24, %s1972_s29, %s1972_s29, %s1973_s18  }
 0x2e9 PF: > { %s2469_s17 = sld [smem:[#allocation17_spill]]  ;;  %s2470_s28 = sld [smem:[#allocation18_spill]] }
 0x2ea   : > { %p2472_p1 = scmp.ge.s32.totalorder %s1961_s16, 2 }
 0x2ef   : > { %s1302_s27 = sand.u32 1, %s2469_s17   ;;  %p2471_p12 = scmp.ne.s32.totalorder %s2470_s28, 0 }
 0x2f0   : > { %s1303_s25 = scalar_lea.sflag [#allocation6], %s1302_s27 }
 0x2f1   : > { %p1674_p2 = pnand %p2472_p1, %p2471_p12 }
 0x2f3   : > { %1944 = dma.done.wait (!%p1674_p2), %s1303_s25, 256  }
 0x2f4   : > { %1946 = vsyncadd (!%p1674_p2), %s1303_s25, 4294967040  ;;  %s2473_s23 = smov %s2179_s13  ;;  %p25_p4 = scmp.ge.s32.totalorder %s2169_s22, 4  }
 0x2f5   : > { %s2474_s13 = smov %s1953_s14  ;;  %s2475_s14 = smov %s1957_s15 }
 0x2f6   : > { %s2476_s15 = smov %s2473_s23  ;;  %s2477_s16 = smov %s2169_s22 }
 0x2f7   :  { %27 = sbr.rel (!%p25_p4) target bundleno = 10 (0xa), region = 121 }
 0x2fe   :  { %1308 = vsyncpa [#allocation5], 1 }
 0x2ff   :  { %1310 = vsyncpa [#allocation5 + $0x1], 1 }
 0x300   :  { %1311 = vsyncpa [#allocation8], 1 }
 0x301   :  { %1312 = vsyncpa [#allocation11], 1 }
 0x302   :  { %1313 = vsyncpa [#allocation6], 1 }
 0x303   :  { %1315 = vsyncpa [#allocation6 + $0x1], 1 }

</bundles_post_ra>
